<compile_context>
chip_gen: v5e
topology: v5e:2x2
jax: 0.10.0
libtpu: 0.0.40
codegen_flags: <defaults>
</compile_context>

<pallas_src>
import functools

import jax
import jax.numpy as jnp
from jax.experimental import pallas as pl
from jax.experimental.pallas import tpu as pltpu


def _leaky_relu(x, slope=0.1):
    return jnp.where(x > 0, x, slope * x)


def mappingnet_kernel(x_ref, wf_ref, bf_ref, we_ref, be_ref, pool_ref,
                      wfc_ref, bfc_ref, out_ref, *, layer):
    # x_ref block: (Bblk*T1, KF_pad) bf16 im2col rows for Bblk sequences.
    m = x_ref.shape[0]

    # ---- first conv (k=7): single long-K matmul (bf16 MXU, f32 accumulate) ----
    out = jnp.dot(x_ref[...], wf_ref[...],
                  preferred_element_type=jnp.float32) + bf_ref[...]   # (m, C) f32

    # ---- encoder blocks: LeakyReLU(0.1) -> Conv1d(k=3, d=3) + residual crop ----
    # Rows stay flattened as (batch, time); the buffer shrinks by 6 rows per
    # layer. Rows whose 3/6-shifted taps cross a sequence boundary are never
    # part of a valid output and are masked out by the pooling matmul below.
    for i in range(layer):
        m_next = m - 6
        h = _leaky_relu(out)                                          # f32
        acc = jnp.dot(h[0:m_next, :].astype(jnp.bfloat16), we_ref[i, 0],
                      preferred_element_type=jnp.float32)
        for k in range(1, 3):
            acc = acc + jnp.dot(
                h[3 * k:3 * k + m_next, :].astype(jnp.bfloat16), we_ref[i, k],
                preferred_element_type=jnp.float32)
        out = acc + be_ref[i] + out[3:3 + m_next, :]                  # residual
        m = m_next

    # ---- AdaptiveAvgPool1d(1): per-sequence masked mean via a small matmul ----
    pooled = jnp.dot(pool_ref[...], out,
                     preferred_element_type=jnp.float32)              # (Bblk, C)

    # ---- fused FC heads (lane-padded to a multiple of 128) ----
    y = jnp.dot(pooled.astype(jnp.bfloat16), wfc_ref[...],
                preferred_element_type=jnp.float32) + bfc_ref[...]
    out_ref[...] = y


def mapping_net_forward(x_btc, params, *, layer, num_bins, num_kp, block_b=16):
    """x_btc: (B, T, Cin) float32.  Returns dict of yaw/pitch/roll/t/exp."""
    B, T, Cin = x_btc.shape
    C = params["w_first"].shape[2]
    OUT = params["w_fc"].shape[1]
    assert T >= 7 + 6 * layer, "sequence too short for this layer count"
    T1 = T - 6

    # ---- im2col for the first conv (kernel 7, dilation 1), built in XLA ----
    x_im2col = jnp.concatenate([x_btc[:, k:k + T1, :] for k in range(7)], axis=-1)
    KF = 7 * Cin
    KF_pad = ((KF + 127) // 128) * 128
    if KF_pad != KF:
        x_im2col = jnp.pad(x_im2col, ((0, 0), (0, 0), (0, KF_pad - KF)))

    # ---- batch blocking: fill the MXU M dimension, amortize grid overhead ----
    if B <= block_b:
        bblk, B_pad = B, B
    else:
        bblk = max(8, (block_b // 8) * 8)   # keep blocks sublane-aligned
        B_pad = ((B + bblk - 1) // bblk) * bblk
    if B_pad != B:
        x_im2col = jnp.pad(x_im2col, ((0, B_pad - B), (0, 0), (0, 0)))
    x_flat = x_im2col.astype(jnp.bfloat16).reshape(B_pad * T1, KF_pad)

    # ---- weights: im2col layout for conv1, bf16 MXU operands, padded FC ----
    OUT_pad = ((OUT + 127) // 128) * 128
    wf = jnp.pad(params["w_first"].reshape(KF, C),
                 ((0, KF_pad - KF), (0, 0))).astype(jnp.bfloat16)     # (KF_pad, C)
    bf = params["b_first"]                                            # (1, C) f32
    we = params["w_enc"].astype(jnp.bfloat16)                         # (L, 3, C, C)
    be = params["b_enc"]                                              # (L, 1, C) f32
    wfc = jnp.pad(params["w_fc"],
                  ((0, 0), (0, OUT_pad - OUT))).astype(jnp.bfloat16)  # (C, OUT_pad)
    bfc = jnp.pad(params["b_fc"], ((0, 0), (0, OUT_pad - OUT)))       # (1, OUT_pad)

    # ---- per-block pooling matrix: masked per-sequence mean (f32) ----
    t_final = T1 - 6 * layer
    m_final = bblk * T1 - 6 * layer
    rows = jnp.arange(bblk, dtype=jnp.int32)[:, None]
    cols = jnp.arange(m_final, dtype=jnp.int32)[None, :]
    in_seq = (cols >= rows * T1) & (cols < rows * T1 + t_final)
    pool_mat = in_seq.astype(jnp.float32) / float(t_final)            # (bblk, m_final)

    kernel = functools.partial(mappingnet_kernel, layer=layer)
    vmem_resident = pl.BlockSpec(memory_space=pltpu.MemorySpace.VMEM)
    out = pl.pallas_call(
        kernel,
        out_shape=jax.ShapeDtypeStruct((B_pad, OUT_pad), jnp.float32),
        grid=(B_pad // bblk,),
        in_specs=[
            pl.BlockSpec((bblk * T1, KF_pad), lambda b: (b, 0)),  # im2col rows
            vmem_resident,   # wf   (KF_pad, C)   bf16, whole-array, single copy
            vmem_resident,   # bf   (1, C)        f32
            vmem_resident,   # we   (L, 3, C, C)  bf16
            vmem_resident,   # be   (L, 1, C)     f32
            vmem_resident,   # pool (bblk, m_f)   f32
            vmem_resident,   # wfc  (C, OUT_pad)  bf16
            vmem_resident,   # bfc  (1, OUT_pad)  f32
        ],
        out_specs=pl.BlockSpec((bblk, OUT_pad), lambda b: (b, 0)),
        compiler_params=pltpu.CompilerParams(
            dimension_semantics=("parallel",),
            vmem_limit_bytes=64 * 1024 * 1024),
    )(x_flat, wf, bf, we, be, pool_mat, wfc, bfc)

    out = out[:B, :OUT]
    # Split fused head columns: [yaw | pitch | roll | t | exp]
    nb = num_bins
    yaw = out[:, 0 * nb:1 * nb]
    pitch = out[:, 1 * nb:2 * nb]
    roll = out[:, 2 * nb:3 * nb]
    t = out[:, 3 * nb:3 * nb + 3]
    exp = out[:, 3 * nb + 3:3 * nb + 3 + 3 * num_kp]
    return {"yaw": yaw, "pitch": pitch, "roll": roll, "t": t, "exp": exp}


# ----------------------- pure-JAX f32 reference (for checking) -----------------------
def reference_forward(x_btc, params, *, layer, num_bins, num_kp):
    def conv1d(h, w, b, dilation):
        K = w.shape[0]
        t_out = h.shape[1] - (K - 1) * dilation
        acc = jnp.zeros((h.shape[0], t_out, w.shape[2]), jnp.float32)
        for k in range(K):
            acc = acc + jnp.einsum("btc,cd->btd",
                                   h[:, k * dilation:k * dilation + t_out, :], w[k])
        return acc + b[None]          # b: (1, Cout)

    out = conv1d(x_btc, params["w_first"], params["b_first"], 1)
    for i in range(layer):
        h = jnp.where(out > 0, out, 0.1 * out)
        out = conv1d(h, params["w_enc"][i], params["b_enc"][i], 3) + out[:, 3:-3, :]
    pooled = out.mean(axis=1)
    y = pooled @ params["w_fc"] + params["b_fc"]
    nb = num_bins
    return {"yaw": y[:, :nb], "pitch": y[:, nb:2 * nb], "roll": y[:, 2 * nb:3 * nb],
            "t": y[:, 3 * nb:3 * nb + 3], "exp": y[:, 3 * nb + 3:3 * nb + 3 + 3 * num_kp]}


# --------------------------------- parameters -------------------------------------
def init_params(key, *, coeff_nc, descriptor_nc, layer, num_kp, num_bins):
    ks = jax.random.split(key, 6)
    C = descriptor_nc
    out_total = 3 * num_bins + 3 + 3 * num_kp
    params = {
        # Conv1d weights stored as (K, C_in, C_out)  (PyTorch stores (C_out, C_in, K))
        "w_first": 0.1 * jax.random.normal(ks[0], (7, coeff_nc, C), jnp.float32),
        "b_first": 0.1 * jax.random.normal(ks[1], (1, C), jnp.float32),
        "w_enc": 0.1 * jax.random.normal(ks[2], (layer, 3, C, C), jnp.float32),
        "b_enc": 0.1 * jax.random.normal(ks[3], (layer, 1, C), jnp.float32),
        # Fused FC heads: columns = [yaw | pitch | roll | t | exp]
        "w_fc": 0.1 * jax.random.normal(ks[4], (C, out_total), jnp.float32),
        "b_fc": 0.1 * jax.random.normal(ks[5], (1, out_total), jnp.float32),
    }
    return params


if __name__ == "__main__":
    # Small, self-consistent config (real SadTalker: coeff_nc=73, C=1024, layer=3).
    B, coeff_nc, descriptor_nc = 2, 4, 32
    layer, num_kp, num_bins = 2, 4, 8
    T = 27  # must satisfy T >= 7 + 6*layer

    key = jax.random.PRNGKey(0)
    k_x, k_p = jax.random.split(key)
    # PyTorch input would be (B, coeff_nc, T); kernel layout is (B, T, coeff_nc).
    x_bct = jax.random.normal(k_x, (B, coeff_nc, T), jnp.float32)
    x_btc = jnp.transpose(x_bct, (0, 2, 1))

    params = init_params(k_p, coeff_nc=coeff_nc, descriptor_nc=descriptor_nc,
                         layer=layer, num_kp=num_kp, num_bins=num_bins)

    out = mapping_net_forward(x_btc, params, layer=layer,
                              num_bins=num_bins, num_kp=num_kp)
    out = jax.tree_util.tree_map(jax.block_until_ready, out)

    ref = reference_forward(x_btc, params, layer=layer,
                            num_bins=num_bins, num_kp=num_kp)
    for name in ("yaw", "pitch", "roll", "t", "exp"):
        assert out[name].shape == ref[name].shape, name
        assert jnp.allclose(out[name], ref[name], rtol=5e-2, atol=5e-2), name

    print("KERNEL_OK")
</pallas_src>

<mosaic_0001>
module attributes {stable_mosaic.version = 11 : i64} {
  func.func @mappingnet_kernel(%arg0: i32, %arg1: memref<42x128xbf16, #tpu.memory_space<vmem>>, %arg2: memref<128x32xbf16, #tpu.memory_space<vmem>>, %arg3: memref<1x32xf32, #tpu.memory_space<vmem>>, %arg4: memref<2x3x32x32xbf16, #tpu.memory_space<vmem>>, %arg5: memref<2x1x32xf32, #tpu.memory_space<vmem>>, %arg6: memref<2x30xf32, #tpu.memory_space<vmem>>, %arg7: memref<32x128xbf16, #tpu.memory_space<vmem>>, %arg8: memref<1x128xf32, #tpu.memory_space<vmem>>, %arg9: memref<2x128xf32, #tpu.memory_space<vmem>>) attributes {dimension_semantics = [#tpu.dimension_semantics<parallel>], iteration_bounds = array<i64: 1>, scalar_prefetch = 0 : i64, scratch_operands = 0 : i64, tpu.core_type = #tpu.core_type<tc>, window_params = [{transform_indices = @transform_0, window_bounds = array<i64: 42, 128>}, {pipeline_mode = #tpu.pipeline_mode<synchronous>, transform_indices = @transform_1, window_bounds = array<i64: 128, 32>}, {pipeline_mode = #tpu.pipeline_mode<synchronous>, transform_indices = @transform_2, window_bounds = array<i64: 1, 32>}, {pipeline_mode = #tpu.pipeline_mode<synchronous>, transform_indices = @transform_3, window_bounds = array<i64: 2, 3, 32, 32>}, {pipeline_mode = #tpu.pipeline_mode<synchronous>, transform_indices = @transform_4, window_bounds = array<i64: 2, 1, 32>}, {pipeline_mode = #tpu.pipeline_mode<synchronous>, transform_indices = @transform_5, window_bounds = array<i64: 2, 30>}, {pipeline_mode = #tpu.pipeline_mode<synchronous>, transform_indices = @transform_6, window_bounds = array<i64: 32, 128>}, {pipeline_mode = #tpu.pipeline_mode<synchronous>, transform_indices = @transform_7, window_bounds = array<i64: 1, 128>}, {transform_indices = @transform_8, window_bounds = array<i64: 2, 128>}]} {
    %c0 = arith.constant 0 : index
    %c0_0 = arith.constant 0 : index
    %0 = vector.load %arg1[%c0, %c0_0] : memref<42x128xbf16, #tpu.memory_space<vmem>>, vector<42x128xbf16>
    %c0_1 = arith.constant 0 : index
    %c0_2 = arith.constant 0 : index
    %1 = vector.load %arg2[%c0_1, %c0_2] : memref<128x32xbf16, #tpu.memory_space<vmem>>, vector<128x32xbf16>
    %cst = arith.constant dense<0.000000e+00> : vector<42x32xf32>
    %2 = tpu.matmul %0, %1, %cst {dimension_numbers = #tpu.dot_dimension_numbers<[1], [0], [0], [1], [0, 0, 1, 1], [], []>} : vector<42x128xbf16>, vector<128x32xbf16>, vector<42x32xf32> -> vector<42x32xf32>
    %c0_3 = arith.constant 0 : index
    %c0_4 = arith.constant 0 : index
    %3 = vector.load %arg3[%c0_3, %c0_4] : memref<1x32xf32, #tpu.memory_space<vmem>>, vector<1x32xf32>
    %4 = vector.broadcast %3 : vector<1x32xf32> to vector<42x32xf32>
    %5 = arith.addf %2, %4 : vector<42x32xf32>
    %cst_5 = arith.constant 0.000000e+00 : f32
    %6 = vector.broadcast %cst_5 : f32 to vector<42x32xf32>
    %7 = arith.cmpf ogt, %5, %6 : vector<42x32xf32>
    %cst_6 = arith.constant 1.000000e-01 : f32
    %8 = vector.broadcast %cst_6 : f32 to vector<42x32xf32>
    %9 = arith.mulf %8, %5 : vector<42x32xf32>
    %10 = arith.select %7, %5, %9 : vector<42x32xi1>, vector<42x32xf32>
    %11 = vector.extract_strided_slice %10 {offsets = [0, 0], sizes = [36, 32], strides = [1, 1]} : vector<42x32xf32> to vector<36x32xf32>
    %12 = arith.truncf %11 : vector<36x32xf32> to vector<36x32xbf16>
    %c0_7 = arith.constant 0 : index
    %c0_8 = arith.constant 0 : index
    %c0_9 = arith.constant 0 : index
    %c0_10 = arith.constant 0 : index
    %13 = vector.load %arg4[%c0_7, %c0_8, %c0_9, %c0_10] : memref<2x3x32x32xbf16, #tpu.memory_space<vmem>>, vector<1x1x32x32xbf16>
    %14 = vector.shape_cast %13 : vector<1x1x32x32xbf16> to vector<32x32xbf16>
    %cst_11 = arith.constant dense<0.000000e+00> : vector<36x32xf32>
    %15 = tpu.matmul %12, %14, %cst_11 {dimension_numbers = #tpu.dot_dimension_numbers<[1], [0], [0], [1], [0, 0, 1, 1], [], []>} : vector<36x32xbf16>, vector<32x32xbf16>, vector<36x32xf32> -> vector<36x32xf32>
    %16 = vector.extract_strided_slice %10 {offsets = [3, 0], sizes = [36, 32], strides = [1, 1]} : vector<42x32xf32> to vector<36x32xf32>
    %17 = arith.truncf %16 : vector<36x32xf32> to vector<36x32xbf16>
    %c0_12 = arith.constant 0 : index
    %c1 = arith.constant 1 : index
    %c0_13 = arith.constant 0 : index
    %c0_14 = arith.constant 0 : index
    %18 = vector.load %arg4[%c0_12, %c1, %c0_13, %c0_14] : memref<2x3x32x32xbf16, #tpu.memory_space<vmem>>, vector<1x1x32x32xbf16>
    %19 = vector.shape_cast %18 : vector<1x1x32x32xbf16> to vector<32x32xbf16>
    %cst_15 = arith.constant dense<0.000000e+00> : vector<36x32xf32>
    %20 = tpu.matmul %17, %19, %cst_15 {dimension_numbers = #tpu.dot_dimension_numbers<[1], [0], [0], [1], [0, 0, 1, 1], [], []>} : vector<36x32xbf16>, vector<32x32xbf16>, vector<36x32xf32> -> vector<36x32xf32>
    %21 = arith.addf %15, %20 : vector<36x32xf32>
    %22 = vector.extract_strided_slice %10 {offsets = [6, 0], sizes = [36, 32], strides = [1, 1]} : vector<42x32xf32> to vector<36x32xf32>
    %23 = arith.truncf %22 : vector<36x32xf32> to vector<36x32xbf16>
    %c0_16 = arith.constant 0 : index
    %c2 = arith.constant 2 : index
    %c0_17 = arith.constant 0 : index
    %c0_18 = arith.constant 0 : index
    %24 = vector.load %arg4[%c0_16, %c2, %c0_17, %c0_18] : memref<2x3x32x32xbf16, #tpu.memory_space<vmem>>, vector<1x1x32x32xbf16>
    %25 = vector.shape_cast %24 : vector<1x1x32x32xbf16> to vector<32x32xbf16>
    %cst_19 = arith.constant dense<0.000000e+00> : vector<36x32xf32>
    %26 = tpu.matmul %23, %25, %cst_19 {dimension_numbers = #tpu.dot_dimension_numbers<[1], [0], [0], [1], [0, 0, 1, 1], [], []>} : vector<36x32xbf16>, vector<32x32xbf16>, vector<36x32xf32> -> vector<36x32xf32>
    %27 = arith.addf %21, %26 : vector<36x32xf32>
    %c0_20 = arith.constant 0 : index
    %c0_21 = arith.constant 0 : index
    %c0_22 = arith.constant 0 : index
    %28 = vector.load %arg5[%c0_20, %c0_21, %c0_22] : memref<2x1x32xf32, #tpu.memory_space<vmem>>, vector<1x1x32xf32>
    %29 = vector.shape_cast %28 : vector<1x1x32xf32> to vector<1x32xf32>
    %30 = vector.broadcast %29 : vector<1x32xf32> to vector<36x32xf32>
    %31 = arith.addf %27, %30 : vector<36x32xf32>
    %32 = vector.extract_strided_slice %5 {offsets = [3, 0], sizes = [36, 32], strides = [1, 1]} : vector<42x32xf32> to vector<36x32xf32>
    %33 = arith.addf %31, %32 : vector<36x32xf32>
    %cst_23 = arith.constant 0.000000e+00 : f32
    %34 = vector.broadcast %cst_23 : f32 to vector<36x32xf32>
    %35 = arith.cmpf ogt, %33, %34 : vector<36x32xf32>
    %cst_24 = arith.constant 1.000000e-01 : f32
    %36 = vector.broadcast %cst_24 : f32 to vector<36x32xf32>
    %37 = arith.mulf %36, %33 : vector<36x32xf32>
    %38 = arith.select %35, %33, %37 : vector<36x32xi1>, vector<36x32xf32>
    %39 = vector.extract_strided_slice %38 {offsets = [0, 0], sizes = [30, 32], strides = [1, 1]} : vector<36x32xf32> to vector<30x32xf32>
    %40 = arith.truncf %39 : vector<30x32xf32> to vector<30x32xbf16>
    %c1_25 = arith.constant 1 : index
    %c0_26 = arith.constant 0 : index
    %c0_27 = arith.constant 0 : index
    %c0_28 = arith.constant 0 : index
    %41 = vector.load %arg4[%c1_25, %c0_26, %c0_27, %c0_28] : memref<2x3x32x32xbf16, #tpu.memory_space<vmem>>, vector<1x1x32x32xbf16>
    %42 = vector.shape_cast %41 : vector<1x1x32x32xbf16> to vector<32x32xbf16>
    %cst_29 = arith.constant dense<0.000000e+00> : vector<30x32xf32>
    %43 = tpu.matmul %40, %42, %cst_29 {dimension_numbers = #tpu.dot_dimension_numbers<[1], [0], [0], [1], [0, 0, 1, 1], [], []>} : vector<30x32xbf16>, vector<32x32xbf16>, vector<30x32xf32> -> vector<30x32xf32>
    %44 = vector.extract_strided_slice %38 {offsets = [3, 0], sizes = [30, 32], strides = [1, 1]} : vector<36x32xf32> to vector<30x32xf32>
    %45 = arith.truncf %44 : vector<30x32xf32> to vector<30x32xbf16>
    %c1_30 = arith.constant 1 : index
    %c1_31 = arith.constant 1 : index
    %c0_32 = arith.constant 0 : index
    %c0_33 = arith.constant 0 : index
    %46 = vector.load %arg4[%c1_30, %c1_31, %c0_32, %c0_33] : memref<2x3x32x32xbf16, #tpu.memory_space<vmem>>, vector<1x1x32x32xbf16>
    %47 = vector.shape_cast %46 : vector<1x1x32x32xbf16> to vector<32x32xbf16>
    %cst_34 = arith.constant dense<0.000000e+00> : vector<30x32xf32>
    %48 = tpu.matmul %45, %47, %cst_34 {dimension_numbers = #tpu.dot_dimension_numbers<[1], [0], [0], [1], [0, 0, 1, 1], [], []>} : vector<30x32xbf16>, vector<32x32xbf16>, vector<30x32xf32> -> vector<30x32xf32>
    %49 = arith.addf %43, %48 : vector<30x32xf32>
    %50 = vector.extract_strided_slice %38 {offsets = [6, 0], sizes = [30, 32], strides = [1, 1]} : vector<36x32xf32> to vector<30x32xf32>
    %51 = arith.truncf %50 : vector<30x32xf32> to vector<30x32xbf16>
    %c1_35 = arith.constant 1 : index
    %c2_36 = arith.constant 2 : index
    %c0_37 = arith.constant 0 : index
    %c0_38 = arith.constant 0 : index
    %52 = vector.load %arg4[%c1_35, %c2_36, %c0_37, %c0_38] : memref<2x3x32x32xbf16, #tpu.memory_space<vmem>>, vector<1x1x32x32xbf16>
    %53 = vector.shape_cast %52 : vector<1x1x32x32xbf16> to vector<32x32xbf16>
    %cst_39 = arith.constant dense<0.000000e+00> : vector<30x32xf32>
    %54 = tpu.matmul %51, %53, %cst_39 {dimension_numbers = #tpu.dot_dimension_numbers<[1], [0], [0], [1], [0, 0, 1, 1], [], []>} : vector<30x32xbf16>, vector<32x32xbf16>, vector<30x32xf32> -> vector<30x32xf32>
    %55 = arith.addf %49, %54 : vector<30x32xf32>
    %c1_40 = arith.constant 1 : index
    %c0_41 = arith.constant 0 : index
    %c0_42 = arith.constant 0 : index
    %56 = vector.load %arg5[%c1_40, %c0_41, %c0_42] : memref<2x1x32xf32, #tpu.memory_space<vmem>>, vector<1x1x32xf32>
    %57 = vector.shape_cast %56 : vector<1x1x32xf32> to vector<1x32xf32>
    %58 = vector.broadcast %57 : vector<1x32xf32> to vector<30x32xf32>
    %59 = arith.addf %55, %58 : vector<30x32xf32>
    %60 = vector.extract_strided_slice %33 {offsets = [3, 0], sizes = [30, 32], strides = [1, 1]} : vector<36x32xf32> to vector<30x32xf32>
    %61 = arith.addf %59, %60 : vector<30x32xf32>
    %c0_43 = arith.constant 0 : index
    %c0_44 = arith.constant 0 : index
    %62 = vector.load %arg6[%c0_43, %c0_44] : memref<2x30xf32, #tpu.memory_space<vmem>>, vector<2x30xf32>
    %cst_45 = arith.constant dense<0.000000e+00> : vector<2x32xf32>
    %63 = tpu.matmul %62, %61, %cst_45 {dimension_numbers = #tpu.dot_dimension_numbers<[1], [0], [0], [1], [0, 0, 1, 1], [], []>} : vector<2x30xf32>, vector<30x32xf32>, vector<2x32xf32> -> vector<2x32xf32>
    %64 = arith.truncf %63 : vector<2x32xf32> to vector<2x32xbf16>
    %c0_46 = arith.constant 0 : index
    %c0_47 = arith.constant 0 : index
    %65 = vector.load %arg7[%c0_46, %c0_47] : memref<32x128xbf16, #tpu.memory_space<vmem>>, vector<32x128xbf16>
    %cst_48 = arith.constant dense<0.000000e+00> : vector<2x128xf32>
    %66 = tpu.matmul %64, %65, %cst_48 {dimension_numbers = #tpu.dot_dimension_numbers<[1], [0], [0], [1], [0, 0, 1, 1], [], []>} : vector<2x32xbf16>, vector<32x128xbf16>, vector<2x128xf32> -> vector<2x128xf32>
    %c0_49 = arith.constant 0 : index
    %c0_50 = arith.constant 0 : index
    %67 = vector.load %arg8[%c0_49, %c0_50] : memref<1x128xf32, #tpu.memory_space<vmem>>, vector<1x128xf32>
    %68 = vector.broadcast %67 : vector<1x128xf32> to vector<2x128xf32>
    %69 = arith.addf %66, %68 : vector<2x128xf32>
    %c0_51 = arith.constant 0 : index
    %c0_52 = arith.constant 0 : index
    %70 = vector.load %arg9[%c0_51, %c0_52] : memref<2x128xf32, #tpu.memory_space<vmem>>, vector<2x128xf32>
    tpu.vector_store %arg9[%c0_51, %c0_52], %69 {strides = array<i32>} : memref<2x128xf32, #tpu.memory_space<vmem>>, vector<2x128xf32>,
    return
  }
  func.func @transform_0(%arg0: i32) -> (i32, i32) {
    %c0_i32 = arith.constant 0 : i32
    %c0_i32_0 = arith.constant 0 : i32
    return %arg0, %c0_i32 : i32, i32
  }
  func.func @transform_1(%arg0: i32) -> (i32, i32) {
    %c0_i32 = arith.constant 0 : i32
    %c0_i32_0 = arith.constant 0 : i32
    %c0_i32_1 = arith.constant 0 : i32
    return %c0_i32, %c0_i32_0 : i32, i32
  }
  func.func @transform_2(%arg0: i32) -> (i32, i32) {
    %c0_i32 = arith.constant 0 : i32
    %c0_i32_0 = arith.constant 0 : i32
    %c0_i32_1 = arith.constant 0 : i32
    return %c0_i32, %c0_i32_0 : i32, i32
  }
  func.func @transform_3(%arg0: i32) -> (i32, i32, i32, i32) {
    %c0_i32 = arith.constant 0 : i32
    %c0_i32_0 = arith.constant 0 : i32
    %c0_i32_1 = arith.constant 0 : i32
    %c0_i32_2 = arith.constant 0 : i32
    %c0_i32_3 = arith.constant 0 : i32
    return %c0_i32, %c0_i32_0, %c0_i32_1, %c0_i32_2 : i32, i32, i32, i32
  }
  func.func @transform_4(%arg0: i32) -> (i32, i32, i32) {
    %c0_i32 = arith.constant 0 : i32
    %c0_i32_0 = arith.constant 0 : i32
    %c0_i32_1 = arith.constant 0 : i32
    %c0_i32_2 = arith.constant 0 : i32
    return %c0_i32, %c0_i32_0, %c0_i32_1 : i32, i32, i32
  }
  func.func @transform_5(%arg0: i32) -> (i32, i32) {
    %c0_i32 = arith.constant 0 : i32
    %c0_i32_0 = arith.constant 0 : i32
    %c0_i32_1 = arith.constant 0 : i32
    return %c0_i32, %c0_i32_0 : i32, i32
  }
  func.func @transform_6(%arg0: i32) -> (i32, i32) {
    %c0_i32 = arith.constant 0 : i32
    %c0_i32_0 = arith.constant 0 : i32
    %c0_i32_1 = arith.constant 0 : i32
    return %c0_i32, %c0_i32_0 : i32, i32
  }
  func.func @transform_7(%arg0: i32) -> (i32, i32) {
    %c0_i32 = arith.constant 0 : i32
    %c0_i32_0 = arith.constant 0 : i32
    %c0_i32_1 = arith.constant 0 : i32
    return %c0_i32, %c0_i32_0 : i32, i32
  }
  func.func @transform_8(%arg0: i32) -> (i32, i32) {
    %c0_i32 = arith.constant 0 : i32
    %c0_i32_0 = arith.constant 0 : i32
    return %arg0, %c0_i32 : i32, i32
  }
}

</mosaic_0001>

<bundles_post_ra>
// kernel: tpu_custom_call.1
= control target key start
LH: loop header
LB: loop body
LE: loop exit
PB: predicated region body
PF: predicated region fallthrough
CT: control target
= control target key end

     0   :  { %13 = vsyncpa [#allocation3], 0  ;;  %s1074_s0 = inlined_call_operand.vmem [shape: bf16[42,128], index: 0, kind: input, shape index: {}]   ;;  %s1075_s1 = inlined_call_operand.vmem [shape: bf16[128,32], index: 1, kind: input, shape index: {}]   ;;  %s1076_s2 = inlined_call_operand.vmem [shape: f32[1,32], index: 2, kind: input, shape index: {}]   ;;  %s1077_s3 = inlined_call_operand.hbm [shape: bf16[2,3,32,32], index: 3, kind: input, shape index: {}]   ;;  %s1078_s4 = inlined_call_operand.vmem [shape: f32[2,1,32], index: 4, kind: input, shape index: {}]   ;;  %s1079_s5 = inlined_call_operand.vmem [shape: f32[2,30], index: 5, kind: input, shape index: {}]   ;;  %s1080_s6 = inlined_call_operand.vmem [shape: bf16[32,128], index: 6, kind: input, shape index: {}]   ;;  %s1081_s7 = inlined_call_operand.vmem [shape: f32[1,128], index: 7, kind: input, shape index: {}]   ;;  %s1082_s8 = inlined_call_operand.hbm [shape: f32[2,128], index: 8, kind: output, shape index: {}]  }
   0x1   :  { %14 = vsyncpa [#allocation4], 0  ;;  %s25_s29 = sshll.u32 %s1077_s3, 4  ;;  %s899_s30 = smov [#allocation2]   ;;  %s26_s29 = int_to_ptr.hbm [resolvable:$true] %s25_s29 }
   0x2   :  { %s27_s9 = sshll.u32 %s899_s30, 4  ;;  %s900_s10 = smov 64   ;;  %s28_s9 = int_to_ptr.vmem [resolvable:$true] %s27_s9 }
   0x3   :  { %s901_s11 = smov 4  }
   0x4   :  { %33 = dma.hbm_to_vmem [thread:$0]  %s26_s29, 1536, %s28_s9, [#allocation3], %s900_s10, %s900_s10, %s901_s11  }
   0x5   :  { %895 = dma.done.wait [#allocation3], 1536  }
   0x6   :  { %896 = vsyncadd [#allocation3], 4294965760  ;;  %v824_v0 = vld [vmem:[%s1075_s1 + $0x38] sm:$0xff]  ;;  %v823_v1 = vld [vmem:[%s1075_s1 + $0x30] sm:$0xff]  ;;  %vm315_vm1 = vcmask 1044480   ;;  %vm232_vm3 = vcmask 261120  }
   0x7   :  { %139 = vmatpush.bf16.msra.mxu0 %v824_v0  ;;  %v822_v2 = vld [vmem:[%s1075_s1 + $0x28] sm:$0xff]  ;;  %v821_v3 = vld [vmem:[%s1075_s1 + $0x20] sm:$0xff]  ;;  %v820_v4 = vld [vmem:[%s1075_s1 + $0x18] sm:$0xff]  ;;  %vm193_vm6 = vsmask.f32 6400  ;;  %vm616_vm14 = vcmask 1045504  }
   0x8   :  { %v819_v5 = vld [vmem:[%s1075_s1 + $0x10] sm:$0xff]  ;;  %v818_v6 = vld [vmem:[%s1075_s1 + $0x8] sm:$0xff]  ;;  %v817_v7 = vld [vmem:[%s1075_s1] sm:$0xff]  ;;  %vm612_vm15 = vcmask 244736   ;;  %s902_s21 = smov [#allocation5]   ;;  %s685_s25 = sshll.u32 %s1082_s8, 4  ;;  %s686_s25 = int_to_ptr.hbm [resolvable:$true] %s685_s25 }
   0x9   :  { %v814_v8 = vld [vmem:[%s1074_s0] sm:$0xff]  ;;  %v815_v9 = vld [vmem:[%s1074_s0 + $0x8] sm:$0xff]  ;;  %v705_v10 = vld [vmem:[%s1074_s0 + $0x10] sm:$0xf]  ;;  %s683_s22 = sshll.u32 %s902_s21, 4  ;;  %s684_s22 = int_to_ptr.vmem [resolvable:$true] %s683_s22 }
   0xa   :  { %v816_v11 = vld [vmem:[%s1074_s0 + $0x10] sm:$0x10]  ;;  %v826_v13 = vld [vmem:[#allocation2 + $0x8] sm:$0xff]  ;;  %v825_v14 = vld [vmem:[#allocation2] sm:$0xff] }
   0xb   :  { %140 = vmatpush.bf16.msra.mxu0 %v823_v1  ;;  %v706_v12 = vor.u32 %v816_v11, %v705_v10  ;;  %289 = vmatpush.bf16.msra.mxu2 %v826_v13  ;;  %v830_v15 = vld [vmem:[#allocation2 + $0x28] sm:$0xff]  ;;  %v828_v16 = vld [vmem:[#allocation2 + $0x18] sm:$0xff]  ;;  %v829_v17 = vld [vmem:[#allocation2 + $0x20] sm:$0xff] }
   0xc   :  { %348 = vmatpush.bf16.msra.mxu3 %v830_v15  ;;  %248 = vmatpush.bf16.msra.mxu1 %v828_v16  ;;  %v843_v19 = vld [vmem:[%s1076_s2] ss:$0 sm:$0xff]  ;;  %v827_v20 = vld [vmem:[#allocation2 + $0x10] sm:$0xff]  ;;  %v832_v15 = vld [vmem:[#allocation2 + $0x38] sm:$0xff] }
   0xf   :  { %141 = vmatpush.bf16.msra.mxu0 %v822_v2  ;;  %290 = vmatpush.bf16.msra.mxu2 %v825_v14 }
  0x10   :  { %349 = vmatpush.bf16.msra.mxu3 %v829_v17  ;;  %249 = vmatpush.bf16.msra.mxu1 %v827_v20  ;;  %v831_v17 = vld [vmem:[#allocation2 + $0x30] sm:$0xff]  ;;  %v834_v20 = vld [vmem:[#allocation2 + $0x48] sm:$0xff] }
  0x13   :  { %142 = vmatpush.bf16.msra.mxu0 %v821_v3  ;;  %513 = vmatpush.bf16.msrb.mxu2 %v832_v15 }
  0x14   :  { %478 = vmatpush.bf16.msrb.mxu1 %v834_v20 }
  0x17   :  { %143 = vmatpush.bf16.msra.mxu0 %v820_v4  ;;  %514 = vmatpush.bf16.msrb.mxu2 %v831_v17 }
  0x1b   :  { %144 = vmatpush.bf16.msra.mxu0 %v819_v5 }
  0x1f   :  { %145 = vmatpush.bf16.msra.mxu0 %v818_v6 }
  0x23   :  { %146 = vmatpush.bf16.msra.mxu0 %v817_v7 }
  0x26   :  { %147 = vmatmul.bf16.vlgmr.msra.gmra.mxu0 %v814_v8 }
  0x36   :  { %152 = vmatmul.bf16.gmra.mxu0 %v815_v9 }
  0x46   :  { %157 = vmatmul.bf16.gmra.mxu0 %v706_v12 }
  0xa3   :  { %v148_v18 = vpop.f32.mrf.mxu0 }
  0xa4   :  { %v149_v21 = vadd.f32 %v843_v19, %v148_v18 }
  0xa6   :  { %v169_v23 = vmul.f32 0.1, %v149_v21  ;;  %vm163_vm0 = vcmp.gt.f32.partialorder %v149_v21, 0.0  ;;  %v385_v25 = vrot.slane %v149_v21, 3 }
  0xa8   :  { %v175_v28 = vsel %vm163_vm0, %v149_v21, %v169_v23 }
  0xab   :  { %v150_v22 = vpop.f32.mrf.mxu0 }
  0xac   :  { %v151_v24 = vadd.f32 %v843_v19, %v150_v22 }
  0xae   :  { %vm164_vm2 = vcmp.gt.f32.partialorder %v151_v24, 0.0  ;;  %v170_v26 = vmul.f32 0.1, %v151_v24  ;;  %v386_v27 = vrot.slane %v151_v24, 3 }
  0xb0   :  { %v176_v29 = vsel %vm164_vm2, %v151_v24, %v170_v26  ;;  %v991_v30 = vsel %vm315_vm1, %v385_v25, %v386_v27  ;;  %v844_v26 = vld [vmem:[%s1078_s4] ss:$0 sm:$0xff] }
  0xb1   :  { %v181_v31 = vpack.c.bf16 %v176_v29, %v175_v28 }
  0xb3   :  { %v153_v32 = vpop.f32.mrf.mxu0  ;;  %758 = vmatmul.msk.bf16.vlgmr.msra.gmra.mxu2 %vm232_vm3, %v181_v31  ;;  %v195_v41 = vshrl.u32 %v181_v31, 16  ;;  %v198_v42 = vshll.u32 %v181_v31, 16  ;;  %v316_v47 = vrot.slane %v181_v31, 3 }
  0xb4   :  { %v154_v33 = vadd.f32 %v843_v19, %v153_v32  ;;  %v833_v32 = vld [vmem:[#allocation2 + $0x40] sm:$0xff] }
  0xb5   :  { %v197_v48 = vrot.slane %v195_v41, 1  ;;  %v200_v51 = vrot.slane %v198_v42, 2  ;;  %479 = vmatpush.bf16.msrb.mxu1 %v833_v32 }
  0xb6   :  { %v388_v34 = vrot.slane %v154_v33, 3  ;;  %v171_v37 = vmul.f32 0.1, %v154_v33  ;;  %vm165_vm4 = vcmp.gt.f32.partialorder %v154_v33, 0.0 }
  0xb7   :  { %v201_v60 = vor.u32 %v200_v51, %v197_v48 }
  0xb8   :  { %v995_v35 = vsel %vm315_vm1, %v386_v27, %v388_v34  ;;  %v177_v43 = vsel %vm165_vm4, %v154_v33, %v171_v37  ;;  %v835_v27 = vld [vmem:[#allocation2 + $0x50] sm:$0xff] }
  0xbb   :  { %v155_v36 = vpop.f32.mrf.mxu0 }
  0xbc   :  { %v156_v38 = vadd.f32 %v843_v19, %v155_v36 }
  0xbe   :  { %vm166_vm5 = vcmp.gt.f32.partialorder %v156_v38, 0.0  ;;  %v172_v39 = vmul.f32 0.1, %v156_v38  ;;  %v390_v40 = vrot.slane %v156_v38, 3 }
  0xc0   :  { %v178_v44 = vsel %vm166_vm5, %v156_v38, %v172_v39  ;;  %v998_v45 = vsel %vm315_vm1, %v388_v34, %v390_v40 }
  0xc1   :  { %v182_v46 = vpack.c.bf16 %v178_v44, %v177_v43 }
  0xc3   :  { %v158_v49 = vpop.f32.mrf.mxu0  ;;  %759 = vmatmul.msk.bf16.gmra.mxu2 %vm232_vm3, %v182_v46  ;;  %v317_v50 = vrot.slane %v182_v46, 3  ;;  %v203_v52 = vshrl.u32 %v182_v46, 16  ;;  %v206_v53 = vshll.u32 %v182_v46, 16 }
  0xc4   :  { %v1001_v54 = vadd.f32 %v843_v19, %v158_v49 }
  0xc5   :  { %v318_v55 = vsel %vm315_vm1, %v316_v47, %v317_v50  ;;  %v205_v56 = vrot.slane %v203_v52, 1  ;;  %v208_v57 = vrot.slane %v206_v53, 2 }
  0xc6   :  { %v173_v58 = vmul.f32 0.1, %v1001_v54  ;;  %v392_v59 = vrot.slane %v1001_v54, 3  ;;  %769 = vmatmul.msk.bf16.vlgmr.msra.gmra.mxu3 %vm232_vm3, %v318_v55  ;;  %vm167_vm7 = vcmp.gt.f32.partialorder %v1001_v54, 0.0 }
  0xc7   :  { %v209_v61 = vor.u32 %v208_v57, %v205_v56 }
  0xc8   :  { %v179_v62 = vsel %vm167_vm7, %v1001_v54, %v173_v58  ;;  %v1012_v63 = vsel %vm315_vm1, %v390_v40, %v392_v59 }
  0xc9   :  { %v210_v0 = vsel %vm193_vm6, %v201_v60, %v209_v61  ;;  %v183_v1 = vpack.c.bf16 %v179_v62, %v179_v62 }
  0xca   :  { %747 = vmatmul.msk.bf16.vlgmr.msra.gmra.mxu1 %vm232_vm3, %v210_v0 }
  0xcb   :  { %v160_v2 = vpop.f32.mrf.mxu0  ;;  %v212_v4 = vshrl.u32 %v183_v1, 16  ;;  %v215_v5 = vshll.u32 %v183_v1, 16 }
  0xcc   :  { %v161_v3 = vadd.f32 %v843_v19, %v160_v2  ;;  %v836_v19 = vld [vmem:[#allocation2 + $0x58] sm:$0xff] }
  0xcd   :  { %v214_v9 = vrot.slane %v212_v4, 1  ;;  %v217_v10 = vrot.slane %v215_v5, 2  ;;  %563 = vmatpush.bf16.msrb.mxu3 %v836_v19 }
  0xce   :  { %vm168_vm8 = vcmp.gt.f32.partialorder %v161_v3, 0.0  ;;  %v174_v6 = vmul.f32 0.1, %v161_v3 }
  0xcf   :  { %v218_v13 = vor.u32 %v217_v10, %v214_v9 }
  0xd0   :  { %v180_v7 = vsel %vm168_vm8, %v161_v3, %v174_v6 }
  0xd1   :  { %v306_v8 = vpack.c.bf16 %v180_v7, %v179_v62  ;;  %v219_v14 = vsel %vm193_vm6, %v209_v61, %v218_v13  ;;  %564 = vmatpush.bf16.msrb.mxu3 %v835_v27 }
  0xd3   :  { %760 = vmatmul.msk.bf16.gmra.mxu2 %vm232_vm3, %v183_v1  ;;  %v319_v11 = vrot.slane %v306_v8, 3 }
  0xd5   :  { %v320_v12 = vsel %vm315_vm1, %v317_v50, %v319_v11 }
  0xd6   :  { %770 = vmatmul.msk.bf16.gmra.mxu3 %vm232_vm3, %v320_v12 }
  0xda   :  { %748 = vmatmul.msk.bf16.gmra.mxu1 %vm232_vm3, %v219_v14 }
  0xe6   :  { %771 = vmatmul.msk.bf16.gmra.mxu3 %vm232_vm3, %v319_v11 }
  0xea   :  { %749 = vmatmul.msk.bf16.gmra.mxu1 %vm232_vm3, %v218_v13 }
 0x136   :  { %v292_v16 = vpop.f32.mrf.mxu2 }
 0x13e   :  { %v294_v18 = vpop.f32.mrf.mxu2 }
 0x146   :  { %v297_v21 = vpop.f32.mrf.mxu2 }
 0x147   :  { %v251_v22 = vpop.f32.mrf.mxu1 }
 0x148   :  { %v293_v23 = vadd.f32 %v292_v16, %v251_v22 }
 0x149   :  { %v351_v24 = vpop.f32.mrf.mxu3 }
 0x14a   :  { %v365_v25 = vadd.f32 %v351_v24, %v293_v23 }
 0x14c   :  { %v374_v28 = vadd.f32 %v844_v26, %v365_v25 }
 0x14e   :  { %v299_v29 = vpop.f32.mrf.mxu2  ;;  %v399_v36 = vadd.f32 %v991_v30, %v374_v28 }
 0x14f   :  { %v253_v31 = vpop.f32.mrf.mxu1 }
 0x150   :  { %v295_v33 = vadd.f32 %v294_v18, %v253_v31  ;;  %v409_v39 = vmul.f32 0.1, %v399_v36  ;;  %vm404_vm9 = vcmp.gt.f32.partialorder %v399_v36, 0.0  ;;  %v594_v43 = vrot.slane %v399_v36, 3 }
 0x151   :  { %v353_v34 = vpop.f32.mrf.mxu3 }
 0x152   :  { %v366_v37 = vadd.f32 %v353_v34, %v295_v33  ;;  %v414_v50 = vsel %vm404_vm9, %v399_v36, %v409_v39 }
 0x154   :  { %v375_v38 = vadd.f32 %v844_v26, %v366_v37 }
 0x156   :  { %v400_v40 = vadd.f32 %v995_v35, %v375_v38  ;;  %v302_v41 = vpop.f32.mrf.mxu2 }
 0x157   :  { %v256_v42 = vpop.f32.mrf.mxu1 }
 0x158   :  { %v410_v44 = vmul.f32 0.1, %v400_v40  ;;  %v298_v46 = vadd.f32 %v297_v21, %v256_v42  ;;  %vm405_vm10 = vcmp.gt.f32.partialorder %v400_v40, 0.0  ;;  %v595_v47 = vrot.slane %v400_v40, 3 }
 0x159   :  { %v356_v48 = vpop.f32.mrf.mxu3 }
 0x15a   :  { %v367_v49 = vadd.f32 %v356_v48, %v298_v46  ;;  %v415_v51 = vsel %vm405_vm10, %v400_v40, %v410_v44  ;;  %v1029_v52 = vsel %vm315_vm1, %v594_v43, %v595_v47  ;;  %v838_v44 = vld [vmem:[%s1080_s6 + $0x8] sm:$0xff] }
 0x15b   :  { %v419_v30 = vpack.c.bf16 %v415_v51, %v414_v50  ;;  %670 = vmatpush.bf16.msrb.mxu0 %v838_v44 }
 0x15c   :  { %v376_v53 = vadd.f32 %v844_v26, %v367_v49 }
 0x15d   :  { %790 = vmatmul.msk.bf16.vlgmr.msrb.gmra.mxu2 %vm232_vm3, %v419_v30  ;;  %v433_v4 = vshrl.u32 %v419_v30, 16  ;;  %v436_v8 = vshll.u32 %v419_v30, 16  ;;  %v534_v15 = vrot.slane %v419_v30, 3 }
 0x15e   :  { %v401_v35 = vadd.f32 %v998_v45, %v376_v53  ;;  %v304_v55 = vpop.f32.mrf.mxu2 }
 0x15f   :  { %v258_v56 = vpop.f32.mrf.mxu1  ;;  %v435_v16 = vrot.slane %v433_v4, 1  ;;  %v438_v17 = vrot.slane %v436_v8, 2 }
 0x160   :  { %v300_v57 = vadd.f32 %v299_v29, %v258_v56  ;;  %v597_v58 = vrot.slane %v401_v35, 3  ;;  %v411_v1 = vmul.f32 0.1, %v401_v35  ;;  %vm406_vm11 = vcmp.gt.f32.partialorder %v401_v35, 0.0 }
 0x161   :  { %v358_v60 = vpop.f32.mrf.mxu3  ;;  %v439_v28 = vor.u32 %v438_v17, %v435_v16 }
 0x162   :  { %v368_v61 = vadd.f32 %v358_v60, %v300_v57  ;;  %v1034_v62 = vsel %vm315_vm1, %v595_v47, %v597_v58  ;;  %v416_v10 = vsel %vm406_vm11, %v401_v35, %v411_v1  ;;  %v837_v47 = vld [vmem:[%s1080_s6] sm:$0xff] }
 0x163   :  { %671 = vmatpush.bf16.msrb.mxu0 %v837_v47  ;;  %v845_v60 = vld [vmem:[%s1078_s4 + $0x1] ss:$0 sm:$0xff] }
 0x164   :  { %v377_v0 = vadd.f32 %v844_v26, %v368_v61 }
 0x166   :  { %v402_v2 = vadd.f32 %v1012_v63, %v377_v0 }
 0x167   :  { %v261_v3 = vpop.f32.mrf.mxu1 }
 0x168   :  { %v412_v5 = vmul.f32 0.1, %v402_v2  ;;  %v303_v6 = vadd.f32 %v302_v41, %v261_v3  ;;  %vm407_vm12 = vcmp.gt.f32.partialorder %v402_v2, 0.0  ;;  %v599_v45 = vrot.slane %v402_v2, 3 }
 0x169   :  { %v361_v7 = vpop.f32.mrf.mxu3 }
 0x16a   :  { %v369_v9 = vadd.f32 %v361_v7, %v303_v6  ;;  %v417_v11 = vsel %vm407_vm12, %v402_v2, %v412_v5  ;;  %v1038_v12 = vsel %vm315_vm1, %v597_v58, %v599_v45 }
 0x16b   :  { %v420_v13 = vpack.c.bf16 %v417_v11, %v416_v10 }
 0x16c   :  { %v378_v14 = vadd.f32 %v844_v26, %v369_v9  ;;  %v611_v9 = vld [vmem:[%s1079_s5] sm:$0x3] }
 0x16d   :  { %791 = vmatmul.msk.bf16.gmra.mxu2 %vm232_vm3, %v420_v13  ;;  %v535_v63 = vrot.slane %v420_v13, 3  ;;  %v441_v18 = vshrl.u32 %v420_v13, 16  ;;  %v444_v19 = vshll.u32 %v420_v13, 16 }
 0x16e   :  { %v403_v20 = vadd.f32 %v392_v59, %v378_v14 }
 0x16f   :  { %v263_v21 = vpop.f32.mrf.mxu1  ;;  %v536_v22 = vsel %vm315_vm1, %v534_v15, %v535_v63  ;;  %v443_v23 = vrot.slane %v441_v18, 1  ;;  %v446_v24 = vrot.slane %v444_v19, 2 }
 0x170   :  { %v413_v25 = vmul.f32 0.1, %v403_v20  ;;  %800 = vmatmul.msk.bf16.vlgmr.msrb.gmra.mxu3 %vm232_vm3, %v536_v22  ;;  %vm408_vm13 = vcmp.gt.f32.partialorder %v403_v20, 0.0  ;;  %v601_v26 = vrot.slane %v403_v20, 3 }
 0x171   :  { %v363_v27 = vpop.f32.mrf.mxu3  ;;  %v447_v29 = vor.u32 %v446_v24, %v443_v23 }
 0x172   :  { %v418_v31 = vsel %vm408_vm13, %v403_v20, %v413_v25  ;;  %v602_v32 = vsel %vm315_vm1, %v599_v45, %v601_v26 }
 0x173   :  { %v448_v33 = vsel %vm193_vm6, %v439_v28, %v447_v29  ;;  %v426_v54 = vpack.c.bf16 %v418_v31, %v418_v31 }
 0x174   :  { %780 = vmatmul.msk.bf16.vlgmr.msrb.gmra.mxu1 %vm232_vm3, %v448_v33 }
 0x175   :  { %v537_v59 = vrot.slane %v426_v54, 3  ;;  %v450_v34 = vshll.u32 %v426_v54, 16 }
 0x177   :  { %v538_v36 = vsel %vm315_vm1, %v535_v63, %v537_v59  ;;  %v452_v37 = vrot.slane %v450_v34, 2 }
 0x179   :  { %v453_v38 = vsel %vm193_vm6, %v447_v29, %v452_v37 }
 0x180   :  { %801 = vmatmul.msk.bf16.gmra.mxu3 %vm232_vm3, %v538_v36 }
 0x184   :  { %781 = vmatmul.msk.bf16.gmra.mxu1 %vm232_vm3, %v453_v38 }
 0x1e0   :  { %v516_v39 = vpop.f32.mrf.mxu2 }
 0x1e8   :  { %v518_v42 = vpop.f32.mrf.mxu2 }
 0x1f0   :  { %v521_v48 = vpop.f32.mrf.mxu2 }
 0x1f1   :  { %v481_v40 = vpop.f32.mrf.mxu1 }
 0x1f2   :  { %v517_v55 = vadd.f32 %v516_v39, %v481_v40 }
 0x1f3   :  { %v566_v41 = vpop.f32.mrf.mxu3 }
 0x1f4   :  { %v576_v1 = vadd.f32 %v566_v41, %v517_v55 }
 0x1f6   :  { %v585_v6 = vadd.f32 %v845_v60, %v576_v1 }
 0x1f8   :  { %v523_v53 = vpop.f32.mrf.mxu2  ;;  %v607_v8 = vadd.f32 %v1029_v52, %v585_v6 }
 0x1f9   :  { %v483_v43 = vpop.f32.mrf.mxu1 }
 0x1fa   :  { %v519_v30 = vadd.f32 %v518_v42, %v483_v43 }
 0x1fb   :  { %v568_v46 = vpop.f32.mrf.mxu3 }
 0x1fc   :  { %v577_v61 = vadd.f32 %v568_v46, %v519_v30 }
 0x1fe   :  { %v586_v4 = vadd.f32 %v845_v60, %v577_v61 }
 0x200   :  { %v608_v7 = vadd.f32 %v1034_v62, %v586_v4 }
 0x201   :  { %v486_v49 = vpop.f32.mrf.mxu1 }
 0x202   :  { %v522_v51 = vadd.f32 %v521_v48, %v486_v49 }
 0x203   :  { %v571_v50 = vpop.f32.mrf.mxu3 }
 0x204   :  { %v578_v56 = vadd.f32 %v571_v50, %v522_v51 }
 0x206   :  { %v587_v2 = vadd.f32 %v845_v60, %v578_v56 }
 0x208   :  { %v609_v45 = vadd.f32 %v1038_v12, %v587_v2  ;;  %v846_v12 = vld [vmem:[%s1081_s7] ss:$0 sm:$0xff] }
 0x209   :  { %v488_v35 = vpop.f32.mrf.mxu1 }
 0x20a   :  { %v524_v57 = vadd.f32 %v523_v53, %v488_v35 }
 0x20b   :  { %v573_v58 = vpop.f32.mrf.mxu3 }
 0x20c   :  { %v579_v0 = vadd.f32 %v573_v58, %v524_v57 }
 0x20e   :  { %v588_v3 = vadd.f32 %v845_v60, %v579_v0 }
 0x210   :  { %v610_v5 = vadd.f32 %v602_v32, %v588_v3 }
 0x212   :  { %803 = vmatpush.msk.msra.mxu1 %vm616_vm14, %v610_v5 }
 0x214   :  { %633 = vmatpush.msra.mxu1 %v609_v45 }
 0x216   :  { %634 = vmatpush.msra.mxu1 %v608_v7 }
 0x218   :  { %635 = vmatpush.msra.mxu1 %v607_v8 }
 0x219   :  { %804 = vmatmul.msk.f32.vlgmr.msra.gmra.mxu1 %vm612_vm15, %v611_v9 }
 0x296   :  { %v637_v10 = vpop.f32.mrf.mxu1 }
 0x297   :  { %v640_v11 = vpack.c.bf16 %v637_v10, %v637_v10 }
 0x299   :  { %813 = vmatmul.msk.bf16.vlgmr.msrb.gmra.mxu0 %vm232_vm3, %v640_v11 }
 0x316   :  { %v673_v52 = vpop.f32.mrf.mxu0 }
 0x317   :  { %v674_v62 = vadd.f32 %v846_v12, %v673_v52 }
 0x319   :  { %677 = vst [vmem:[#allocation5] sm:$0x3] %v674_v62 }
 0x31a   :  { %688 = dma.vmem_to_hbm [thread:$0]  %s684_s22, 32, %s686_s25, [#allocation4]  }
 0x31e   :  { %v675_v13 = vpop.f32.mrf.mxu0 }
 0x31f   :  { %897 = dma.done.wait [#allocation4], 32  }
 0x320   :  { %898 = vsyncadd [#allocation4], 4294967264 }
 0x321   :  { %693 = vsyncpa [#allocation3], 1 }
 0x322   :  { %694 = vsyncpa [#allocation4], 1 }

</bundles_post_ra>
